<compile_context>
chip_gen: v7x
topology: tpu7x:2x2x1
jax: 0.10.0
libtpu: 0.0.40
codegen_flags: <defaults>
</compile_context>

<pallas_src>
import functools

import jax
import jax.numpy as jnp
from jax.experimental import pallas as pl
from jax.experimental.pallas import tpu as pltpu


def mlp_kernel(x_ref, w1_ref, b1_ref, w2_ref, b2_ref, o_ref):
    # Layer 1 on the MXU: (tb, F) @ (F, Hp) -> (tb, Hp), f32 accumulation.
    # x is cast to the weight dtype (bf16 by default) so the MXU runs its
    # native low-precision path; bias add + ReLU and everything after stay f32.
    x = x_ref[...].astype(w1_ref.dtype)
    h = jnp.dot(x, w1_ref[...], preferred_element_type=jnp.float32)
    h = jnp.maximum(h + b1_ref[...], 0.0)                       # (tb, Hp) f32

    # Layer 2 (num_class == 1): VPU multiply + XLU lane reduction instead of an
    # N=1 MXU matmul.  w2 is a (1, Hp) f32 row; padded hidden units contribute
    # exactly zero.  b2 comes from SMEM as a scalar.
    logit = jnp.sum(h * w2_ref[...], axis=-1, keepdims=True) + b2_ref[0, 0]
    y = jax.nn.sigmoid(logit)                                   # (tb, 1) f32

    # Lane-packed store: 128 logits per 128-lane output row (few-vreg relayout),
    # so the writeback is 4 B/row instead of a replicated 512 B/row slab.
    o_ref[...] = y.reshape(o_ref.shape).astype(o_ref.dtype)


def _round_up(n, m):
    return ((n + m - 1) // m) * m


def _pick_tb(batch, target=2048):
    """Batch tile: a multiple of 128 (lane-packed output rows), as large as
    possible (~2K rows) to amortize the ~0.35us per-grid-step overhead, and for
    big batches an EVEN number of grid steps so dimension_semantics=('parallel',)
    load-balances across both v7x TensorCores."""
    b128 = _round_up(batch, 128)
    if b128 <= target:
        return b128                       # single step; tiny batches are latency-bound
    n = -(-b128 // target)                # steps needed at the target tile
    if n % 2:
        n += 1                            # even step count for the 2-TC megacore
    return _round_up(-(-batch // n), 128)


@functools.partial(jax.jit, static_argnames=("tb", "compute_dtype"))
def neural_net_forward(x, w1, b1, w2, b2, *, tb=None, compute_dtype=jnp.bfloat16):
    """Pallas forward of NeuralNet: sigmoid(relu(x@W1+b1)@W2+b2), num_class==1.

    Note: compute_dtype=bfloat16 (default) gives ~2e-2 abs accuracy on the
    sigmoid outputs; pass compute_dtype=jnp.float32 for f32 parity.
    """
    B, F = x.shape
    H = w1.shape[1]
    C = w2.shape[1]
    assert C == 1, "kernel is specialized for num_class == 1 (per module spec)"

    if tb is None:
        tb = _pick_tb(B)
    assert tb % 128 == 0, "batch tile must be a multiple of 128 (packed output)"
    n_blocks = -(-B // tb)
    B_pad = n_blocks * tb
    Hp = _round_up(H, 128)
    rows = tb // 128

    # Zero-pad: hidden dim (padded units are 0 through ReLU and multiplied by 0
    # in layer 2) and, only when ragged, the batch rows (sliced off below).
    # allow_input_fusion lets XLA fuse the pad into the kernel's input DMA.
    if B_pad != B:
        x = jnp.pad(x, ((0, B_pad - B), (0, 0)))
    w1p = jnp.pad(w1, ((0, 0), (0, Hp - H))).astype(compute_dtype)   # (F, Hp)
    b1p = jnp.pad(b1, ((0, 0), (0, Hp - H)))                         # (1, Hp) f32
    w2p = jnp.pad(w2.T, ((0, 0), (0, Hp - H)))                       # (1, Hp) f32

    out = pl.pallas_call(
        mlp_kernel,
        out_shape=jax.ShapeDtypeStruct((n_blocks, rows, 128), jnp.float32),
        grid=(n_blocks,),
        in_specs=[
            pl.BlockSpec((tb, F), lambda i: (i, 0)),            # x tile over batch
            pl.BlockSpec((F, Hp), lambda i: (0, 0)),            # W1 (resident)
            pl.BlockSpec((1, Hp), lambda i: (0, 0)),            # b1
            pl.BlockSpec((1, Hp), lambda i: (0, 0)),            # W2 row
            pl.BlockSpec(memory_space=pltpu.MemorySpace.SMEM),  # b2 scalar
        ],
        out_specs=pl.BlockSpec((1, rows, 128), lambda i: (i, 0, 0)),
        compiler_params=pltpu.CompilerParams(
            dimension_semantics=("parallel",),
            allow_input_fusion=[True, False, False, False, False],
        ),
    )(x, w1p, b1p, w2p, b2)

    # Unpack the lane-packed logits (row-major: block, 128-row group, lane).
    return out.reshape(-1)[:B].reshape(B, 1)


def init_params(key, n_features, hidden_size, num_class):
    """Deterministic PyTorch-style Linear init: U(-1/sqrt(fan_in), 1/sqrt(fan_in))."""
    k1, k2, k3, k4 = jax.random.split(key, 4)
    bound1 = 1.0 / jnp.sqrt(n_features)
    bound2 = 1.0 / jnp.sqrt(hidden_size)
    # stored already transposed: [in, out]
    w1 = jax.random.uniform(k1, (n_features, hidden_size), jnp.float32, -bound1, bound1)
    b1 = jax.random.uniform(k2, (1, hidden_size), jnp.float32, -bound1, bound1)
    w2 = jax.random.uniform(k3, (hidden_size, num_class), jnp.float32, -bound2, bound2)
    b2 = jax.random.uniform(k4, (1, num_class), jnp.float32, -bound2, bound2)
    return w1, b1, w2, b2


if __name__ == "__main__":
    # Module hyperparameters (hidden_size=50, num_class=1 from the script).
    n_features = 32
    hidden_size = 50
    num_class = 1

    key = jax.random.PRNGKey(0)
    kx, kp = jax.random.split(key)
    w1, b1, w2, b2 = init_params(kp, n_features, hidden_size, num_class)

    def ref_forward(x):
        # Pure-JAX f32 reference (same semantics as the PyTorch forward).
        return jax.nn.sigmoid(jnp.maximum(x @ w1 + b1, 0.0) @ w2 + b2)

    # batch=300 / 2500 are ragged (exercise batch padding; 2500 gives a 2-step
    # even 'parallel' grid); batch=8 exercises the tiny-batch path.
    cases = [
        (300,  jnp.bfloat16, 2e-2),   # default perf path: bf16 MXU inputs
        (300,  jnp.float32,  1e-3),   # f32 path
        (8,    jnp.float32,  1e-3),
        (2500, jnp.bfloat16, 2e-2),   # multi-step, even grid, lane-packed output
    ]
    for batch, dtype, atol in cases:
        x = jax.random.normal(jax.random.fold_in(kx, batch), (batch, n_features),
                              jnp.float32)
        y = neural_net_forward(x, w1, b1, w2, b2, compute_dtype=dtype)
        y = jax.block_until_ready(y)
        ref = ref_forward(x)
        assert y.shape == (batch, num_class)
        assert jnp.allclose(y, ref, atol=atol), f"mismatch: batch={batch} dtype={dtype}"

    print("KERNEL_OK")
</pallas_src>

<mosaic_0001>
module attributes {stable_mosaic.version = 11 : i64} {
  func.func @mlp_kernel(%arg0: i32, %arg1: memref<384x32xf32, #tpu.memory_space<vmem>>, %arg2: memref<32x128xbf16, #tpu.memory_space<vmem>>, %arg3: memref<1x128xf32, #tpu.memory_space<vmem>>, %arg4: memref<1x128xf32, #tpu.memory_space<vmem>>, %arg5: memref<1x1xf32, #tpu.memory_space<smem>>, %arg6: memref<1x3x128xf32, #tpu.memory_space<vmem>>) attributes {dimension_semantics = [#tpu.dimension_semantics<parallel>], iteration_bounds = array<i64: 1>, scalar_prefetch = 0 : i64, scratch_operands = 0 : i64, tpu.core_type = #tpu.core_type<tc>, window_params = [{transform_indices = @transform_0, window_bounds = array<i64: 384, 32>}, {pipeline_mode = #tpu.pipeline_mode<synchronous>, transform_indices = @transform_1, window_bounds = array<i64: 32, 128>}, {pipeline_mode = #tpu.pipeline_mode<synchronous>, transform_indices = @transform_2, window_bounds = array<i64: 1, 128>}, {pipeline_mode = #tpu.pipeline_mode<synchronous>, transform_indices = @transform_3, window_bounds = array<i64: 1, 128>}, {transform_indices = @transform_4, window_bounds = array<i64: 1, 1>}, {transform_indices = @transform_5, window_bounds = array<i64: 1, 3, 128>}]} {
    %c0 = arith.constant 0 : index
    %c0_0 = arith.constant 0 : index
    %0 = vector.load %arg1[%c0, %c0_0] : memref<384x32xf32, #tpu.memory_space<vmem>>, vector<384x32xf32>
    %1 = arith.truncf %0 : vector<384x32xf32> to vector<384x32xbf16>
    %c0_1 = arith.constant 0 : index
    %c0_2 = arith.constant 0 : index
    %2 = vector.load %arg2[%c0_1, %c0_2] : memref<32x128xbf16, #tpu.memory_space<vmem>>, vector<32x128xbf16>
    %cst = arith.constant dense<0.000000e+00> : vector<384x128xf32>
    %3 = tpu.matmul %1, %2, %cst {dimension_numbers = #tpu.dot_dimension_numbers<[1], [0], [0], [1], [0, 0, 1, 1], [], []>} : vector<384x32xbf16>, vector<32x128xbf16>, vector<384x128xf32> -> vector<384x128xf32>
    %c0_3 = arith.constant 0 : index
    %c0_4 = arith.constant 0 : index
    %4 = vector.load %arg3[%c0_3, %c0_4] : memref<1x128xf32, #tpu.memory_space<vmem>>, vector<1x128xf32>
    %5 = vector.broadcast %4 : vector<1x128xf32> to vector<384x128xf32>
    %6 = arith.addf %3, %5 : vector<384x128xf32>
    %cst_5 = arith.constant 0.000000e+00 : f32
    %7 = vector.broadcast %cst_5 : f32 to vector<384x128xf32>
    %8 = arith.maximumf %6, %7 : vector<384x128xf32>
    %c0_6 = arith.constant 0 : index
    %c0_7 = arith.constant 0 : index
    %9 = vector.load %arg4[%c0_6, %c0_7] : memref<1x128xf32, #tpu.memory_space<vmem>>, vector<1x128xf32>
    %10 = vector.broadcast %9 : vector<1x128xf32> to vector<384x128xf32>
    %11 = arith.mulf %8, %10 : vector<384x128xf32>
    %cst_8 = arith.constant dense<0.000000e+00> : vector<384xf32>
    %12 = vector.multi_reduction <add>, %11, %cst_8 [1] : vector<384x128xf32> to vector<384xf32>
    %13 = vector.shape_cast %12 : vector<384xf32> to vector<384x1xf32>
    %c0_9 = arith.constant 0 : index
    %c0_10 = arith.constant 0 : index
    %14 = memref.load %arg5[%c0_9, %c0_10] : memref<1x1xf32, #tpu.memory_space<smem>>
    %15 = vector.broadcast %14 : f32 to vector<384x1xf32>
    %16 = arith.addf %13, %15 : vector<384x1xf32>
    %17 = arith.negf %16 : vector<384x1xf32>
    %18 = math.exp %17 : vector<384x1xf32>
    %cst_11 = arith.constant 1.000000e+00 : f32
    %19 = vector.broadcast %cst_11 : f32 to vector<384x1xf32>
    %20 = arith.addf %19, %18 : vector<384x1xf32>
    %21 = arith.divf %19, %20 : vector<384x1xf32>
    %22 = vector.shape_cast %21 : vector<384x1xf32> to vector<1x3x128xf32>
    %c0_12 = arith.constant 0 : index
    %c0_13 = arith.constant 0 : index
    %c0_14 = arith.constant 0 : index
    %23 = vector.load %arg6[%c0_12, %c0_13, %c0_14] : memref<1x3x128xf32, #tpu.memory_space<vmem>>, vector<1x3x128xf32>
    tpu.vector_store %arg6[%c0_12, %c0_13, %c0_14], %22 {strides = array<i32>} : memref<1x3x128xf32, #tpu.memory_space<vmem>>, vector<1x3x128xf32>,
    return
  }
  func.func @transform_0(%arg0: i32) -> (i32, i32) {
    %c0_i32 = arith.constant 0 : i32
    %c0_i32_0 = arith.constant 0 : i32
    return %arg0, %c0_i32 : i32, i32
  }
  func.func @transform_1(%arg0: i32) -> (i32, i32) {
    %c0_i32 = arith.constant 0 : i32
    %c0_i32_0 = arith.constant 0 : i32
    %c0_i32_1 = arith.constant 0 : i32
    return %c0_i32, %c0_i32_0 : i32, i32
  }
  func.func @transform_2(%arg0: i32) -> (i32, i32) {
    %c0_i32 = arith.constant 0 : i32
    %c0_i32_0 = arith.constant 0 : i32
    %c0_i32_1 = arith.constant 0 : i32
    return %c0_i32, %c0_i32_0 : i32, i32
  }
  func.func @transform_3(%arg0: i32) -> (i32, i32) {
    %c0_i32 = arith.constant 0 : i32
    %c0_i32_0 = arith.constant 0 : i32
    %c0_i32_1 = arith.constant 0 : i32
    return %c0_i32, %c0_i32_0 : i32, i32
  }
  func.func @transform_4(%arg0: i32) -> (i32, i32) {
    %c0_i32 = arith.constant 0 : i32
    %c0_i32_0 = arith.constant 0 : i32
    %c0_i32_1 = arith.constant 0 : i32
    return %c0_i32, %c0_i32_0 : i32, i32
  }
  func.func @transform_5(%arg0: i32) -> (i32, i32, i32) {
    %c0_i32 = arith.constant 0 : i32
    %c0_i32_0 = arith.constant 0 : i32
    %c0_i32_1 = arith.constant 0 : i32
    return %arg0, %c0_i32, %c0_i32_0 : i32, i32, i32
  }
}

</mosaic_0001>

<bundles_post_ra>
// kernel: neural_net_forward.2
= control target key start
LH: loop header
LB: loop body
LE: loop exit
PB: predicated region body
PF: predicated region fallthrough
CT: control target
= control target key end

     0   :  { %v29_v2 = vlaneseq  ;;  %vm717_vm1 = vcmask 261120   ;;  %vm1611_vm3 = vcmask 130112   ;;  %vm1618_vm4 = vcmask 195712   ;;  %s3031_s0 = inlined_call_operand.vmem [shape: bf16[32,128], index: 0, kind: input, shape index: {}]   ;;  %s3032_s1 = inlined_call_operand.vmem [shape: f32[1,128], index: 1, kind: input, shape index: {}]   ;;  %s3033_s2 = inlined_call_operand.vmem [shape: f32[1,128], index: 2, kind: input, shape index: {}]   ;;  %s3034_s3 = inlined_call_operand.<no memory space> [shape: f32[1,1], index: 3, kind: input, shape index: {}]   ;;  %s3035_s4 = inlined_call_operand.vmem [shape: f32[300,32], index: 4, kind: input, shape index: {}]   ;;  %s3036_s5 = inlined_call_operand.<no memory space> [shape: f32[], index: 5, kind: input, shape index: {}]   ;;  %s3037_s6 = inlined_call_operand.vmem [shape: f32[1,3,128], index: 6, kind: output, shape index: {}]  }
   0x1   :  { %v2306_v0 = vstv %s3036_s5  ;;  %v2074_v1 = vld [vmem:[%s3031_s0] sm:$0xff]   ;;  %v2075_v3 = vld [vmem:[%s3031_s0 + $0x8] sm:$0xff]   ;;  %v1880_v9 = vld [vmem:[%s3035_s4 + $0x10] sm:$0xff]  ;;  %vm1625_vm5 = vcmask 261312   ;;  %vm1632_vm6 = vcmask 326912   ;;  %vm1639_vm7 = vcmask 392512  }
   0x2   :  { %2018 = vmatprep.subr.bf16.mxu0 %v2074_v1  ;;  %2070 = vmatprep.subr.bf16.mxu1 %v2074_v1  ;;  %v23_v4 = vld [vmem:[%s3035_s4] sm:$0xff]  ;;  %v2317_v5 = vand.u32 127, %v29_v2  ;;  %v1879_v6 = vld [vmem:[%s3035_s4 + $0x8] sm:$0xff]  ;;  %v1881_v10 = vld [vmem:[%s3035_s4 + $0x18] sm:$0xff]  ;;  %v2341_v13 = vshrl.u32 %v29_v2, 7  ;;  %vm1646_vm8 = vcmask 458112  }
   0x3   :  { %v1902_v7 = vld [vmem:[%s3035_s4 + $0xc0] sm:$0xff]  ;;  %2019 = vmatpush3.bf16.msra.mxu0 %v2074_v1  ;;  %2072 = vmatpush3.bf16.msra.mxu1 %v2074_v1  ;;  %v1903_v8 = vld [vmem:[%s3035_s4 + $0xc8] sm:$0xff]  ;;  %v1904_v11 = vld [vmem:[%s3035_s4 + $0xd0] sm:$0xff]  ;;  %vm1653_vm9 = vcmask 523712   ;;  %vm1660_vm10 = vcmask 589312   ;;  %vm1667_vm11 = vcmask 654912  }
   0x4   :  { %2020 = vmatprep.subr.bf16.mxu0 %v2075_v3  ;;  %2071 = vmatprep.subr.bf16.mxu1 %v2075_v3  ;;  %vm32_vm0 = vcmp.lt.s32.totalorder %v2317_v5, 32  ;;  %v1905_v12 = vld [vmem:[%s3035_s4 + $0xd8] sm:$0xff]  ;;  %v1882_v18 = vld [vmem:[%s3035_s4 + $0x20] sm:$0xff]  ;;  %v1883_v19 = vld [vmem:[%s3035_s4 + $0x28] sm:$0xff]  ;;  %v580_v44 = vadd.s32 296, %v2341_v13  ;;  %vm1674_vm12 = vcmask 720512  }
   0x5   :  { %v33_v14 = vsel %vm32_vm0, %v23_v4, %v2306_v0  ;;  %v47_v15 = vsel %vm32_vm0, %v1879_v6, %v2306_v0  ;;  %v392_v16 = vsel %vm32_vm0, %v1902_v7, %v2306_v0  ;;  %v407_v17 = vsel %vm32_vm0, %v1903_v8, %v2306_v0  ;;  %v1906_v24 = vld [vmem:[%s3035_s4 + $0xe0] sm:$0xff]  ;;  %v1884_v28 = vld [vmem:[%s3035_s4 + $0x30] sm:$0xff]  ;;  %v1907_v29 = vld [vmem:[%s3035_s4 + $0xe8] sm:$0xff] }
   0x6   :  { %v670_v20 = vpack.c.bf16 %v47_v15, %v33_v14  ;;  %v682_v21 = vpack.c.bf16 %v407_v17, %v392_v16  ;;  %v62_v22 = vsel %vm32_vm0, %v1880_v9, %v2306_v0  ;;  %v77_v23 = vsel %vm32_vm0, %v1881_v10, %v2306_v0  ;;  %v1885_v33 = vld [vmem:[%s3035_s4 + $0x38] sm:$0xff]  ;;  %v1908_v34 = vld [vmem:[%s3035_s4 + $0xf0] sm:$0xff]  ;;  %v1886_v38 = vld [vmem:[%s3035_s4 + $0x40] sm:$0xff] }
   0x7   :  { %2021 = vmatpush3.bf16.msra.mxu0 %v2075_v3  ;;  %2073 = vmatpush3.bf16.msra.mxu1 %v2075_v3  ;;  %v671_v25 = vpack.c.bf16 %v77_v23, %v62_v22  ;;  %v422_v26 = vsel %vm32_vm0, %v1904_v11, %v2306_v0  ;;  %v437_v27 = vsel %vm32_vm0, %v1905_v12, %v2306_v0  ;;  %v1909_v35 = vld [vmem:[%s3035_s4 + $0xf8] sm:$0xff]  ;;  %v1887_v39 = vld [vmem:[%s3035_s4 + $0x48] sm:$0xff]  ;;  %v1910_v42 = vld [vmem:[%s3035_s4 + $0x100] sm:$0xff]  ;;  %vm581_vm2 = vcmp.lt.s32.totalorder %v580_v44, 300 }
   0x8   :  { %2022 = vmatprep.mubr.msk.bf16.mxu0 %vm717_vm1, %v670_v20  ;;  %2046 = vmatprep.mubr.msk.bf16.mxu1 %vm717_vm1, %v682_v21  ;;  %v683_v30 = vpack.c.bf16 %v437_v27, %v422_v26  ;;  %v92_v31 = vsel %vm32_vm0, %v1882_v18, %v2306_v0  ;;  %v107_v32 = vsel %vm32_vm0, %v1883_v19, %v2306_v0  ;;  %v1911_v43 = vld [vmem:[%s3035_s4 + $0x108] sm:$0xff]  ;;  %v1888_v57 = vld [vmem:[%s3035_s4 + $0x50] sm:$0xff]  ;;  %v1889_v59 = vld [vmem:[%s3035_s4 + $0x58] sm:$0xff]  ;;  %vm1681_vm13 = vcmask 786112  }
   0x9   :  { %v672_v36 = vpack.c.bf16 %v107_v32, %v92_v31  ;;  %v452_v37 = vsel %vm32_vm0, %v1906_v24, %v2306_v0  ;;  %v122_v40 = vsel %vm32_vm0, %v1884_v28, %v2306_v0  ;;  %v467_v41 = vsel %vm32_vm0, %v1907_v29, %v2306_v0  ;;  %v1915_v55 = vld [vmem:[%s3035_s4 + $0x128] sm:$0xff]  ;;  %v1912_v60 = vld [vmem:[%s3035_s4 + $0x110] sm:$0xff]  ;;  %v1913_v61 = vld [vmem:[%s3035_s4 + $0x118] sm:$0xff] }
   0xa   :  { %2023 = vmatmul.mubr.msk.bf16.vlgmr.msra.gmra.mrb[0].mxu0 %vm717_vm1, %v671_v25  ;;  %2047 = vmatmul.mubr.msk.bf16.vlgmr.msra.gmra.mrb[0].mxu1 %vm717_vm1, %v683_v30  ;;  %v137_v45 = vsel %vm32_vm0, %v1885_v33, %v2306_v0  ;;  %v684_v46 = vpack.c.bf16 %v467_v41, %v452_v37  ;;  %v482_v47 = vsel %vm32_vm0, %v1908_v34, %v2306_v0  ;;  %v1890_v62 = vld [vmem:[%s3035_s4 + $0x60] sm:$0xff]  ;;  %v1891_v63 = vld [vmem:[%s3035_s4 + $0x68] sm:$0xff]  ;;  %v1892_v17 = vld [vmem:[%s3035_s4 + $0x70] sm:$0xff]  ;;  %vm1688_vm14 = vcmask 851712  }
   0xb   :  { %2026 = vmatprep.mubr.msk.bf16.mxu0 %vm717_vm1, %v672_v36  ;;  %v497_v48 = vsel %vm32_vm0, %v1909_v35, %v2306_v0  ;;  %v152_v49 = vsel %vm32_vm0, %v1886_v38, %v2306_v0  ;;  %v167_v50 = vsel %vm32_vm0, %v1887_v39, %v2306_v0  ;;  %v512_v51 = vsel %vm32_vm0, %v1910_v42, %v2306_v0  ;;  %v1914_v1 = vld [vmem:[%s3035_s4 + $0x120] sm:$0xff]  ;;  %v1893_v18 = vld [vmem:[%s3035_s4 + $0x78] sm:$0xff]  ;;  %v1895_v20 = vld [vmem:[%s3035_s4 + $0x88] sm:$0xff] }
   0xc   :  { %2050 = vmatprep.mubr.msk.bf16.mxu1 %vm717_vm1, %v684_v46  ;;  %v527_v52 = vsel %vm32_vm0, %v1911_v43, %v2306_v0  ;;  %v673_v53 = vpack.c.bf16 %v137_v45, %v122_v40  ;;  %v685_v54 = vpack.c.bf16 %v497_v48, %v482_v47  ;;  %v674_v56 = vpack.c.bf16 %v167_v50, %v152_v49  ;;  %v1894_v19 = vld [vmem:[%s3035_s4 + $0x80] sm:$0xff]  ;;  %v1896_v28 = vld [vmem:[%s3035_s4 + $0x90] sm:$0xff]  ;;  %v1897_v29 = vld [vmem:[%s3035_s4 + $0x98] sm:$0xff] }
   0xd   :  { %v686_v58 = vpack.c.bf16 %v527_v52, %v512_v51  ;;  %v582_v2 = vsel %vm581_vm2, %v1915_v55, %v2306_v0  ;;  %v182_v3 = vsel %vm32_vm0, %v1888_v57, %v2306_v0  ;;  %v197_v4 = vsel %vm32_vm0, %v1889_v59, %v2306_v0  ;;  %v1898_v30 = vld [vmem:[%s3035_s4 + $0xa0] sm:$0xff]  ;;  %v1899_v31 = vld [vmem:[%s3035_s4 + $0xa8] sm:$0xff]  ;;  %v1900_v38 = vld [vmem:[%s3035_s4 + $0xb0] sm:$0xff] }
   0xe   :  { %v542_v6 = vsel %vm32_vm0, %v1912_v60, %v2306_v0  ;;  %v557_v7 = vsel %vm32_vm0, %v1913_v61, %v2306_v0  ;;  %v212_v8 = vsel %vm32_vm0, %v1890_v62, %v2306_v0  ;;  %v227_v9 = vsel %vm32_vm0, %v1891_v63, %v2306_v0  ;;  %v1901_v39 = vld [vmem:[%s3035_s4 + $0xb8] sm:$0xff]  ;;  %v2578_v43 = vld [vmem:[%s3032_s1] ss:$0 sm:$0xff] }
   0xf   :  { %v572_v10 = vsel %vm32_vm0, %v1914_v1, %v2306_v0  ;;  %v587_v11 = vsel %vm32_vm0, %v582_v2, %v2306_v0  ;;  %v675_v12 = vpack.c.bf16 %v197_v4, %v182_v3  ;;  %v687_v14 = vpack.c.bf16 %v557_v7, %v542_v6  ;;  %v2585_v51 = vld [vmem:[%s3033_s2] ss:$0 sm:$0xff] }
  0x10   :  { %v676_v15 = vpack.c.bf16 %v227_v9, %v212_v8  ;;  %v688_v16 = vpack.c.bf16 %v587_v11, %v572_v10  ;;  %v242_v21 = vsel %vm32_vm0, %v1892_v17, %v2306_v0  ;;  %v257_v22 = vsel %vm32_vm0, %v1893_v18, %v2306_v0 }
  0x11   :  { %v272_v23 = vsel %vm32_vm0, %v1894_v19, %v2306_v0  ;;  %v287_v24 = vsel %vm32_vm0, %v1895_v20, %v2306_v0  ;;  %v677_v25 = vpack.c.bf16 %v257_v22, %v242_v21  ;;  %v689_v26 = vpack.c.bf16 %v2306_v0, %v2306_v0 }
  0x12   :  { %2027 = vmatmul.mubr.msk.bf16.gmra.mrb[4].mxu0 %vm717_vm1, %v673_v53  ;;  %2051 = vmatmul.mubr.msk.bf16.gmra.mrb[4].mxu1 %vm717_vm1, %v685_v54  ;;  %v678_v27 = vpack.c.bf16 %v287_v24, %v272_v23  ;;  %v302_v32 = vsel %vm32_vm0, %v1896_v28, %v2306_v0  ;;  %v317_v33 = vsel %vm32_vm0, %v1897_v29, %v2306_v0  ;;  %vm1695_vm15 = vcmask 917312  }
  0x13   :  { %2030 = vmatprep.mubr.msk.bf16.mxu0 %vm717_vm1, %v674_v56  ;;  %2054 = vmatprep.mubr.msk.bf16.mxu1 %vm717_vm1, %v686_v58  ;;  %v332_v34 = vsel %vm32_vm0, %v1898_v30, %v2306_v0  ;;  %v347_v35 = vsel %vm32_vm0, %v1899_v31, %v2306_v0  ;;  %v679_v36 = vpack.c.bf16 %v317_v33, %v302_v32  ;;  %vm1869_vm2 = vcmask 1041409  }
  0x14   :  { %v680_v37 = vpack.c.bf16 %v347_v35, %v332_v34  ;;  %v362_v40 = vsel %vm32_vm0, %v1900_v38, %v2306_v0  ;;  %v377_v41 = vsel %vm32_vm0, %v1901_v39, %v2306_v0  ;;  %vm1702_vm0 = vcmask 982912  }
  0x15   :  { %v681_v42 = vpack.c.bf16 %v377_v41, %v362_v40 }
  0x1a   :  { %2031 = vmatmul.mubr.msk.bf16.gmra.mrb[8].mxu0 %vm717_vm1, %v675_v12  ;;  %2055 = vmatmul.mubr.msk.bf16.gmra.mrb[8].mxu1 %vm717_vm1, %v687_v14 }
  0x1b   :  { %2034 = vmatprep.mubr.msk.bf16.mxu0 %vm717_vm1, %v676_v15  ;;  %2058 = vmatprep.mubr.msk.bf16.mxu1 %vm717_vm1, %v688_v16 }
  0x22   :  { %2035 = vmatmul.mubr.msk.bf16.gmra.mrb[12].mxu0 %vm717_vm1, %v677_v25  ;;  %2059 = vmatmul.mubr.msk.bf16.gmra.mrb[12].mxu1 %vm717_vm1, %v689_v26 }
  0x23   :  { %2038 = vmatprep.mubr.msk.bf16.mxu0 %vm717_vm1, %v678_v27  ;;  %2062 = vmatprep.mubr.msk.bf16.mxu1 %vm717_vm1, %v689_v26 }
  0x2a   :  { %2039 = vmatmul.mubr.msk.bf16.gmra.mrb[16].mxu0 %vm717_vm1, %v679_v36  ;;  %2063 = vmatmul.mubr.msk.bf16.gmra.mrb[16].mxu1 %vm717_vm1, %v689_v26 }
  0x2b   :  { %2042 = vmatprep.mubr.msk.bf16.mxu0 %vm717_vm1, %v680_v37  ;;  %2066 = vmatprep.mubr.msk.bf16.mxu1 %vm717_vm1, %v689_v26 }
  0x32   :  { %2043 = vmatmul.mubr.msk.bf16.gmra.mrb[20].mxu0 %vm717_vm1, %v681_v42  ;;  %2067 = vmatmul.mubr.msk.bf16.gmra.mrb[20].mxu1 %vm717_vm1, %v689_v26  ;;  %vm1709_vm1 = vcmask 1048512  }
  0xdd   :  { %v2024_v44 = vpop.f32.mrb[0].mxu0  ;;  %v2048_v45 = vpop.f32.mrb[0].mxu1 }
  0xde   :  { %v833_v46 = vadd.f32 %v2024_v44, %v2578_v43  ;;  %v929_v47 = vadd.f32 %v2048_v45, %v2578_v43  ;;  %v824_v48 = vpop.f32.mrb[1].mxu0  ;;  %v920_v0 = vpop.f32.mrb[1].mxu1 }
  0xdf   :  { %v2025_v49 = vpop.f32.mrb[2].mxu0  ;;  %v2049_v50 = vpop.f32.mrb[2].mxu1  ;;  %v825_v58 = vadd.f32 %v2578_v43, %v824_v48  ;;  %v921_v3 = vadd.f32 %v2578_v43, %v920_v0 }
  0xe0   :  { %v1017_v52 = vmax.f32 %v833_v46, 0.0  ;;  %v932_v53 = vadd.f32 %v2049_v50, %v2578_v43  ;;  %v827_v54 = vpop.f32.mrb[3].mxu0  ;;  %v923_v55 = vpop.f32.mrb[3].mxu1  ;;  %v1041_v57 = vmax.f32 %v929_v47, 0.0  ;;  %v836_v18 = vadd.f32 %v2025_v49, %v2578_v43 }
  0xe1   :  { %v924_v56 = vadd.f32 %v2578_v43, %v923_v55  ;;  %v1015_v2 = vmax.f32 %v825_v58, 0.0  ;;  %v1039_v19 = vmax.f32 %v921_v3, 0.0  ;;  %v828_v29 = vadd.f32 %v2578_v43, %v827_v54 }
  0xe2   :  { %v1042_v59 = vmax.f32 %v932_v53, 0.0  ;;  %v1072_v60 = vmul.f32 %v2585_v51, %v1017_v52  ;;  %v1096_v7 = vmul.f32 %v2585_v51, %v1041_v57  ;;  %v1018_v28 = vmax.f32 %v836_v18, 0.0 }
  0xe3   :  { %v1040_v61 = vmax.f32 %v924_v56, 0.0  ;;  %v1070_v21 = vmul.f32 %v2585_v51, %v1015_v2  ;;  %v1094_v31 = vmul.f32 %v2585_v51, %v1039_v19  ;;  %v1016_v40 = vmax.f32 %v828_v29, 0.0 }
  0xe4   :  { %1122 = vadd.xlane.f32.xlu0 %v1072_v60  ;;  %v1097_v62 = vmul.f32 %v2585_v51, %v1042_v59  ;;  %v1073_v44 = vmul.f32 %v2585_v51, %v1018_v28 }
  0xe5   :  { %v2028_v63 = vpop.f32.mrb[4].mxu0  ;;  %v2052_v1 = vpop.f32.mrb[4].mxu1  ;;  %v1095_v15 = vmul.f32 %v2585_v51, %v1040_v61  ;;  %v1071_v50 = vmul.f32 %v2585_v51, %v1016_v40 }
  0xe6   :  { %v849_v4 = vadd.f32 %v2028_v63, %v2578_v43  ;;  %1172 = vadd.xlane.f32.xlu1 %v1097_v62  ;;  %v840_v6 = vpop.f32.mrb[5].mxu0  ;;  %v936_v8 = vpop.f32.mrb[5].mxu1  ;;  %v945_v41 = vadd.f32 %v2052_v1, %v2578_v43 }
  0xe7   :  { %v2029_v9 = vpop.f32.mrb[6].mxu0  ;;  %v2053_v10 = vpop.f32.mrb[6].mxu1  ;;  %v841_v12 = vadd.f32 %v2578_v43, %v840_v6  ;;  %v937_v49 = vadd.f32 %v2578_v43, %v936_v8 }
  0xe8   :  { %v1021_v11 = vmax.f32 %v849_v4, 0.0  ;;  %1170 = vadd.xlane.f32.xlu0 %v1096_v7  ;;  %v843_v14 = vpop.f32.mrb[7].mxu0  ;;  %v948_v16 = vadd.f32 %v2053_v10, %v2578_v43  ;;  %v939_v17 = vpop.f32.mrb[7].mxu1  ;;  %v1045_v0 = vmax.f32 %v945_v41, 0.0  ;;  %v852_v63 = vadd.f32 %v2029_v9, %v2578_v43 }
  0xe9   :  { %v1019_v23 = vmax.f32 %v841_v12, 0.0  ;;  %v940_v24 = vadd.f32 %v2578_v43, %v939_v17  ;;  %v1043_v1 = vmax.f32 %v937_v49, 0.0  ;;  %v844_v4 = vadd.f32 %v2578_v43, %v843_v14 }
  0xea   :  { %1168 = vadd.xlane.f32.xlu1 %v1095_v15  ;;  %v1046_v20 = vmax.f32 %v948_v16, 0.0  ;;  %v1076_v22 = vmul.f32 %v2585_v51, %v1021_v11  ;;  %v1100_v2 = vmul.f32 %v2585_v51, %v1045_v0  ;;  %v1022_v17 = vmax.f32 %v852_v63, 0.0 }
  0xeb   :  { %v1044_v36 = vmax.f32 %v940_v24, 0.0  ;;  %v1074_v37 = vmul.f32 %v2585_v51, %v1019_v23  ;;  %v1098_v18 = vmul.f32 %v2585_v51, %v1043_v1 }
  0xec   :  { %1118 = vadd.xlane.f32.xlu0 %v1070_v21  ;;  %v2603_v25 = vmul.f32 %v2585_v51, %v1046_v20  ;;  %v1077_v41 = vmul.f32 %v2585_v51, %v1022_v17 }
  0xed   :  { %v2032_v26 = vpop.f32.mrb[8].mxu0  ;;  %v2056_v27 = vpop.f32.mrb[8].mxu1  ;;  %v1099_v46 = vmul.f32 %v2585_v51, %v1044_v36 }
  0xee   :  { %1130 = vadd.xlane.f32.xlu1 %v1076_v22  ;;  %v865_v30 = vadd.f32 %v2032_v26, %v2578_v43  ;;  %v856_v32 = vpop.f32.mrb[9].mxu0  ;;  %v952_v33 = vpop.f32.mrb[9].mxu1  ;;  %v961_v12 = vadd.f32 %v2056_v27, %v2578_v43  ;;  %v1020_v22 = vmax.f32 %v844_v4, 0.0 }
  0xef   :  { %v2608_v34 = vpop.f32.mrb[10].mxu0  ;;  %v2057_v35 = vpop.f32.mrb[10].mxu1  ;;  %v857_v45 = vadd.f32 %v2578_v43, %v856_v32  ;;  %v2651_v23 = vadd.f32 %v2578_v43, %v952_v33 }
  0xf0   :  { %1166 = vadd.xlane.f32.xlu0 %v1094_v31  ;;  %v2611_v38 = vpop.f32.mrb[11].mxu0  ;;  %v955_v39 = vpop.f32.mrb[11].mxu1  ;;  %v1025_v42 = vmax.f32 %v865_v30, 0.0  ;;  %v964_v58 = vadd.f32 %v2057_v35, %v2578_v43  ;;  %v1049_v36 = vmax.f32 %v961_v12, 0.0  ;;  %v2670_v49 = vadd.f32 %v2608_v34, %v2578_v43 }
  0xf1   :  { %v1023_v57 = vmax.f32 %v857_v45, 0.0  ;;  %v956_v8 = vadd.f32 %v2578_v43, %v955_v39 }
  0xf2   :  { %1126 = vadd.xlane.f32.xlu1 %v1074_v37  ;;  %v1080_v52 = vmul.f32 %v2585_v51, %v1025_v42  ;;  %v1050_v7 = vmax.f32 %v964_v58, 0.0 }
  0xf3   :  { %v1078_v10 = vmul.f32 %v2585_v51, %v1023_v57  ;;  %v1048_v28 = vmax.f32 %v956_v8, 0.0  ;;  %v1047_v57 = vmax.f32 %v2651_v23, 0.0 }
  0xf4   :  { %1124 = vadd.xlane.f32.xlu0 %v1073_v44  ;;  %v1105_v29 = vmul.f32 %v2585_v51, %v1050_v7 }
  0xf5   :  { %v2036_v47 = vpop.f32.mrb[12].mxu0  ;;  %v2617_v48 = vpop.f32.mrb[12].mxu1 }
  0xf6   :  { %1176 = vadd.xlane.f32.xlu1 %v1099_v46  ;;  %v872_v53 = vpop.f32.mrb[13].mxu0  ;;  %v2622_v54 = vpop.f32.mrb[13].mxu1  ;;  %v881_v14 = vadd.f32 %v2036_v47, %v2578_v43 }
  0xf7   :  { %v2037_v55 = vpop.f32.mrb[14].mxu0  ;;  %v2624_v56 = vpop.f32.mrb[14].mxu1  ;;  %v873_v45 = vadd.f32 %v2578_v43, %v872_v53  ;;  %v1104_v53 = vmul.f32 %v2585_v51, %v1049_v36 }
  0xf8   :  { %1120 = vadd.xlane.f32.xlu0 %v1071_v50  ;;  %v884_v59 = vadd.f32 %v2037_v55, %v2578_v43  ;;  %v875_v60 = vpop.f32.mrb[15].mxu0  ;;  %v2628_v61 = vpop.f32.mrb[15].mxu1  ;;  %v1029_v40 = vmax.f32 %v881_v14, 0.0  ;;  %v1103_v50 = vmul.f32 %v2585_v51, %v1048_v28 }
  0xf9   :  { %v876_v62 = vadd.f32 %v2578_v43, %v875_v60  ;;  %v972_v7 = vadd.f32 %v2578_v43, %v2628_v61 }
  0xfa   :  { %1138 = vadd.xlane.f32.xlu1 %v1080_v52  ;;  %v1030_v3 = vmax.f32 %v884_v59, 0.0  ;;  %v1075_v52 = vmul.f32 %v2585_v51, %v1020_v22  ;;  %v1084_v63 = vmul.f32 %v2585_v51, %v1029_v40 }
  0xfb   :  { %v1028_v6 = vmax.f32 %v876_v62, 0.0  ;;  %v980_v62 = vadd.f32 %v2624_v56, %v2578_v43 }
  0xfc   :  { %1178 = vadd.xlane.f32.xlu0 %v1100_v2  ;;  %v2637_v11 = vmul.f32 %v2585_v51, %v1030_v3 }
  0xfd   :  { %v2640_v9 = vpop.f32.mrb[16].mxu0  ;;  %v2064_v15 = vpop.f32.mrb[16].mxu1  ;;  %v2643_v16 = vmul.f32 %v2585_v51, %v1028_v6  ;;  %v1027_v6 = vmax.f32 %v873_v45, 0.0  ;;  %v1026_v45 = vmax.f32 %v2670_v49, 0.0 }
  0xfe   :  { %1134 = vadd.xlane.f32.xlu1 %v1078_v10  ;;  %v2647_v19 = vpop.f32.mrb[17].mxu0  ;;  %v993_v20 = vadd.f32 %v2064_v15, %v2578_v43  ;;  %v984_v21 = vpop.f32.mrb[17].mxu1 }
  0xff   :  { %v2653_v24 = vpop.f32.mrb[18].mxu0  ;;  %v985_v26 = vadd.f32 %v2578_v43, %v984_v21  ;;  %v2065_v27 = vpop.f32.mrb[18].mxu1  ;;  %v1081_v49 = vmul.f32 %v2585_v51, %v1026_v45 }
 0x100   :  { %1174 = vadd.xlane.f32.xlu0 %v1098_v18  ;;  %v891_v30 = vpop.f32.mrb[19].mxu0  ;;  %v1057_v31 = vmax.f32 %v993_v20, 0.0  ;;  %v996_v32 = vadd.f32 %v2065_v27, %v2578_v43  ;;  %v987_v35 = vpop.f32.mrb[19].mxu1 }
 0x101   :  { %v892_v37 = vadd.f32 %v2578_v43, %v891_v30  ;;  %v1055_v39 = vmax.f32 %v985_v26, 0.0  ;;  %v988_v33 = vadd.f32 %v2578_v43, %v987_v35 }
 0x102   :  { %1188 = vadd.xlane.f32.xlu1 %v1105_v29  ;;  %v1058_v42 = vmax.f32 %v996_v32, 0.0  ;;  %v2662_v44 = vmul.f32 %v2585_v51, %v1057_v31 }
 0x103   :  { %v1032_v46 = vmax.f32 %v892_v37, 0.0  ;;  %v1056_v47 = vmax.f32 %v988_v33, 0.0  ;;  %v2666_v0 = vmul.f32 %v2585_v51, %v1055_v39  ;;  %v1054_v37 = vmax.f32 %v980_v62, 0.0 }
 0x104   :  { %1132 = vadd.xlane.f32.xlu0 %v1077_v41  ;;  %v2675_v55 = vmul.f32 %v2585_v51, %v1058_v42  ;;  %v1082_v39 = vmul.f32 %v2585_v51, %v1027_v6 }
 0x105   :  { %v2044_v58 = vpop.f32.mrb[20].mxu0  ;;  %v2680_v59 = vmul.f32 %v2585_v51, %v1032_v46  ;;  %v2683_v60 = vmul.f32 %v2585_v51, %v1056_v47  ;;  %v2068_v34 = vpop.f32.mrb[20].mxu1  ;;  %v860_v46 = vadd.f32 %v2578_v43, %v2611_v38  ;;  %v897_v47 = vadd.f32 %v2640_v9, %v2578_v43 }
 0x106   :  { %1184 = vadd.xlane.f32.xlu1 %v1103_v50  ;;  %v913_v1 = vadd.f32 %v2044_v58, %v2578_v43  ;;  %v904_v2 = vpop.f32.mrb[21].mxu0  ;;  %v1009_v3 = vadd.f32 %v2068_v34, %v2578_v43  ;;  %v1000_v4 = vpop.f32.mrb[21].mxu1  ;;  %v1102_v50 = vmul.f32 %v2585_v51, %v1047_v57  ;;  %v977_v34 = vadd.f32 %v2617_v48, %v2578_v43 }
 0x107   :  { %v905_v8 = vadd.f32 %v2578_v43, %v904_v2  ;;  %v2045_v10 = vpop.f32.mrb[22].mxu0  ;;  %v1001_v12 = vadd.f32 %v2578_v43, %v1000_v4  ;;  %v2069_v15 = vpop.f32.mrb[22].mxu1  ;;  %v1024_v58 = vmax.f32 %v860_v46, 0.0  ;;  %v1033_v62 = vmax.f32 %v897_v47, 0.0 }
 0x108   :  { %1128 = vadd.xlane.f32.xlu0 %v1075_v52  ;;  %v1037_v56 = vmax.f32 %v913_v1, 0.0  ;;  %v916_v17 = vadd.f32 %v2045_v10, %v2578_v43  ;;  %v907_v14 = vpop.f32.mrb[23].mxu0  ;;  %v1061_v18 = vmax.f32 %v1009_v3, 0.0  ;;  %v1012_v20 = vadd.f32 %v2069_v15, %v2578_v43  ;;  %v1003_v21 = vpop.f32.mrb[23].mxu1 }
 0x109   :  { %v1035_v22 = vmax.f32 %v905_v8, 0.0  ;;  %v908_v23 = vadd.f32 %v2578_v43, %v907_v14  ;;  %v1059_v26 = vmax.f32 %v1001_v12, 0.0  ;;  %v1004_v61 = vadd.f32 %v2578_v43, %v1003_v21 }
 0x10a   :  { %1146 = vadd.xlane.f32.xlu1 %v1084_v63  ;;  %v1038_v27 = vmax.f32 %v916_v17, 0.0  ;;  %v1092_v28 = vmul.f32 %v2585_v51, %v1037_v56  ;;  %v1062_v29 = vmax.f32 %v1012_v20, 0.0  ;;  %v1116_v30 = vmul.f32 %v2585_v51, %v1061_v18 }
 0x10b   :  { %v1036_v31 = vmax.f32 %v908_v23, 0.0  ;;  %v1060_v32 = vmax.f32 %v1004_v61, 0.0  ;;  %v1090_v35 = vmul.f32 %v2585_v51, %v1035_v22  ;;  %v1114_v36 = vmul.f32 %v2585_v51, %v1059_v26 }
 0x10c   :  { %1186 = vadd.xlane.f32.xlu0 %v1104_v53  ;;  %v1093_v33 = vmul.f32 %v2585_v51, %v1038_v27  ;;  %v1117_v40 = vmul.f32 %v2585_v51, %v1062_v29  ;;  %v1052_v52 = vmax.f32 %v972_v7, 0.0  ;;  %v1109_v53 = vmul.f32 %v2585_v51, %v1054_v37 }
 0x10d   :  { %v1091_v41 = vmul.f32 %v2585_v51, %v1036_v31  ;;  %v1115_v42 = vmul.f32 %v2585_v51, %v1060_v32  ;;  %v889_v38 = vadd.f32 %v2578_v43, %v2647_v19  ;;  %v1053_v63 = vmax.f32 %v977_v34, 0.0 }
 0x10e   :  { %1142 = vadd.xlane.f32.xlu1 %v1082_v39  ;;  %v1107_v9 = vmul.f32 %v2585_v51, %v1052_v52  ;;  %v969_v57 = vadd.f32 %v2578_v43, %v2622_v54  ;;  %v1079_v1 = vmul.f32 %v2585_v51, %v1024_v58  ;;  %v1088_v2 = vmul.f32 %v2585_v51, %v1033_v62 }
 0x10f   :  { %v1031_v48 = vmax.f32 %v889_v38, 0.0  ;;  %v900_v3 = vadd.f32 %v2653_v24, %v2578_v43  ;;  %v1108_v19 = vmul.f32 %v2585_v51, %v1053_v63  ;;  %v2741_v43 = vstv %s3034_s3 }
 0x110   :  { %1182 = vadd.xlane.f32.xlu0 %v1102_v50  ;;  %v1051_v4 = vmax.f32 %v969_v57, 0.0 }
 0x111   :  { %v1034_v6 = vmax.f32 %v900_v3, 0.0  ;;  %v1086_v7 = vmul.f32 %v2585_v51, %v1031_v48 }
 0x112   :  { %1196 = vadd.xlane.f32.xlu1 %v1109_v53  ;;  %v1106_v54 = vmul.f32 %v2585_v51, %v1051_v4 }
 0x113   :  { %v1089_v8 = vmul.f32 %v2585_v51, %v1034_v6 }
 0x114   :  { %1140 = vadd.xlane.f32.xlu0 %v1081_v49 }
 0x116   :  { %1192 = vadd.xlane.f32.xlu1 %v1107_v9 }
 0x118   :  { %1136 = vadd.xlane.f32.xlu0 %v1079_v1 }
 0x11a   :  { %1154 = vadd.xlane.f32.xlu1 %v1088_v2 }
 0x11c   :  { %1194 = vadd.xlane.f32.xlu0 %v1108_v19 }
 0x11e   :  { %1150 = vadd.xlane.f32.xlu1 %v1086_v7 }
 0x120   :  { %1190 = vadd.xlane.f32.xlu0 %v1106_v54 }
 0x122   :  { %1156 = vadd.xlane.f32.xlu1 %v1089_v8 }
 0x124   :  { %1144 = vadd.xlane.f32.xlu0 %v2643_v16 }
 0x126   :  { %1204 = vadd.xlane.f32.xlu1 %v2675_v55 }
 0x128   :  { %1202 = vadd.xlane.f32.xlu0 %v2662_v44 }
 0x12a   :  { %1152 = vadd.xlane.f32.xlu1 %v2680_v59 }
 0x12c   :  { %1198 = vadd.xlane.f32.xlu0 %v2666_v0 }
 0x12e   :  { %1200 = vadd.xlane.f32.xlu1 %v2683_v60 }
 0x130   :  { %1162 = vadd.xlane.f32.xlu0 %v1092_v28 }
 0x132   :  { %1164 = vadd.xlane.f32.xlu1 %v1093_v33 }
 0x134   :  { %1158 = vadd.xlane.f32.xlu0 %v1090_v35 }
 0x136   :  { %1160 = vadd.xlane.f32.xlu1 %v1091_v41 }
 0x138   :  { %1148 = vadd.xlane.f32.xlu0 %v2637_v11 }
 0x13a   :  { %1180 = vadd.xlane.f32.xlu1 %v2603_v25 }
 0x13c   :  { %1206 = vadd.xlane.f32.xlu0 %v1114_v36 }
 0x13e   :  { %1208 = vadd.xlane.f32.xlu1 %v1115_v42 }
 0x140   :  { %1210 = vadd.xlane.f32.xlu0 %v1116_v30 }
 0x142   :  { %1212 = vadd.xlane.f32.xlu1 %v1117_v40 }
 0x171   :  { %v1123_v51 = vpop.xlane.xlu0 %1122 }
 0x172   :  { %v1218_v24 = vadd.f32 %v2741_v43, %v1123_v51 }
 0x173   :  { %v1173_v16 = vpop.xlane.xlu1 %1172 }
 0x174   :  { %v1243_v44 = vadd.f32 %v2741_v43, %v1173_v16  ;;  %v1946_v11 = vmul.f32 -1.442695, %v1218_v24 }
 0x175   :  { %v1171_v0 = vpop.xlane.xlu0 %1170 }
 0x176   :  { %v1242_v25 = vadd.f32 %v2741_v43, %v1171_v0  ;;  %v1971_v59 = vmul.f32 -1.442695, %v1243_v44  ;;  %2076 = vpow2.f32 %v1946_v11 }
 0x177   :  { %v1169_v55 = vpop.xlane.xlu1 %1168 }
 0x178   :  { %v1970_v15 = vmul.f32 -1.442695, %v1242_v25  ;;  %2078 = vpow2.f32 %v1971_v59  ;;  %v1241_v14 = vadd.f32 %v2741_v43, %v1169_v55 }
 0x179   :  { %v1119_v60 = vpop.xlane.xlu0 %1118 }
 0x17a   :  { %v1216_v10 = vadd.f32 %v2741_v43, %v1119_v60  ;;  %2080 = vpow2.f32 %v1970_v15  ;;  %v1969_v27 = vmul.f32 -1.442695, %v1241_v14  ;;  %v1613_v15 = vadd.s32 4294967280, %v2317_v5 }
 0x17b   :  { %v1131_v12 = vpop.xlane.xlu1 %1130 }
 0x17c   :  { %v1944_v56 = vmul.f32 -1.442695, %v1216_v10  ;;  %v1222_v20 = vadd.f32 %v2741_v43, %v1131_v12 }
 0x17d   :  { %v1167_v17 = vpop.xlane.xlu0 %1166 }
 0x17e   :  { %2082 = vpow2.f32 %v1944_v56  ;;  %v1240_v22 = vadd.f32 %v2741_v43, %v1167_v17  ;;  %v1950_v29 = vmul.f32 -1.442695, %v1222_v20  ;;  %v1627_v20 = vadd.s32 4294967264, %v2317_v5 }
 0x17f   :  { %v1127_v18 = vpop.xlane.xlu1 %1126 }
 0x180   :  { %v1220_v21 = vadd.f32 %v2741_v43, %v1127_v18  ;;  %v1968_v32 = vmul.f32 -1.442695, %v1240_v22  ;;  %v2077_v36 = vpop.eup %2076 }
 0x181   :  { %v1125_v23 = vpop.xlane.xlu0 %1124  ;;  %v1410_v45 = vadd.f32 1.0, %v2077_v36 }
 0x182   :  { %v1948_v26 = vmul.f32 -1.442695, %v1220_v21  ;;  %v1219_v61 = vadd.f32 %v2741_v43, %v1125_v23  ;;  %v2079_v39 = vpop.eup %2078 }
 0x183   :  { %v1177_v28 = vpop.xlane.xlu1 %1176  ;;  %v1435_v50 = vadd.f32 1.0, %v2079_v39 }
 0x184   :  { %2084 = vpow2.f32 %v1948_v26  ;;  %v1947_v30 = vmul.f32 -1.442695, %v1219_v61  ;;  %v1245_v31 = vadd.f32 %v2741_v43, %v1177_v28  ;;  %v2081_v47 = vpop.eup %2080  ;;  %v1620_v26 = vadd.s32 4294967272, %v2317_v5 }
 0x185   :  { %v1121_v35 = vpop.xlane.xlu0 %1120  ;;  %v1434_v38 = vadd.f32 1.0, %v2081_v47 }
 0x186   :  { %2086 = vpow2.f32 %v1947_v30  ;;  %v1217_v37 = vadd.f32 %v2741_v43, %v1121_v35  ;;  %v1973_v40 = vmul.f32 -1.442695, %v1245_v31  ;;  %v2774_v35 = vsub.s32 %v1613_v15, %v2341_v13 }
 0x187   :  { %2088 = vpow2.f32 %v1969_v27  ;;  %v1139_v33 = vpop.xlane.xlu1 %1138  ;;  %v1606_v27 = vadd.s32 4294967288, %v2317_v5 }
 0x188   :  { %2090 = vpow2.f32 %v1950_v29  ;;  %v1945_v41 = vmul.f32 -1.442695, %v1217_v37  ;;  %v1226_v42 = vadd.f32 %v2741_v43, %v1139_v33  ;;  %v2083_v53 = vpop.eup %2082 }
 0x189   :  { %2092 = vpow2.f32 %v1968_v32  ;;  %v1179_v46 = vpop.xlane.xlu0 %1178  ;;  %v1408_v57 = vadd.f32 1.0, %v2083_v53  ;;  %v2788_v47 = vsub.s32 %v1606_v27, %v2341_v13 }
 0x18a   :  { %2094 = vpow2.f32 %v1945_v41  ;;  %v1246_v52 = vadd.f32 %v2741_v43, %v1179_v46  ;;  %v1954_v58 = vmul.f32 -1.442695, %v1226_v42  ;;  %v2782_v41 = vsub.s32 %v1627_v20, %v2341_v13 }
 0x18b   :  { %v1135_v34 = vpop.xlane.xlu1 %1134  ;;  %2096 = vpow2.f32 %v1973_v40  ;;  %v2779_v40 = vsub.s32 %v2317_v5, %v2341_v13  ;;  %v2785_v46 = vsub.s32 %v1620_v26, %v2341_v13 }
 0x18c   :  { %v1974_v62 = vmul.f32 -1.442695, %v1246_v52  ;;  %v1224_v49 = vadd.f32 %v2741_v43, %v1135_v34  ;;  %2098 = vrcp.f32 %v1410_v45 }
 0x18d   :  { %v1175_v9 = vpop.xlane.xlu0 %1174  ;;  %2100 = vrcp.f32 %v1435_v50 }
 0x18e   :  { %v2085_v63 = vpop.eup %2084  ;;  %v1244_v1 = vadd.f32 %v2741_v43, %v1175_v9  ;;  %2102 = vpow2.f32 %v1954_v58  ;;  %v1952_v2 = vmul.f32 -1.442695, %v1224_v49 }
 0x18f   :  { %v1189_v48 = vpop.xlane.xlu1 %1188  ;;  %v1412_v4 = vadd.f32 1.0, %v2085_v63  ;;  %2104 = vpow2.f32 %v1974_v62 }
 0x190   :  { %v2087_v3 = vpop.eup %2086  ;;  %2106 = vrcp.f32 %v1434_v38  ;;  %v1972_v6 = vmul.f32 -1.442695, %v1244_v1  ;;  %v1251_v0 = vadd.f32 %v2741_v43, %v1189_v48 }
 0x191   :  { %v2089_v19 = vpop.eup %2088  ;;  %v1133_v7 = vpop.xlane.xlu0 %1132  ;;  %2108 = vrcp.f32 %v1408_v57  ;;  %v1411_v8 = vadd.f32 1.0, %v2087_v3 }
 0x192   :  { %v2091_v54 = vpop.eup %2090  ;;  %2110 = vpow2.f32 %v1952_v2  ;;  %v1433_v44 = vadd.f32 1.0, %v2089_v19  ;;  %v1223_v60 = vadd.f32 %v2741_v43, %v1133_v7  ;;  %v1979_v21 = vmul.f32 -1.442695, %v1251_v0 }
 0x193   :  { %v2093_v51 = vpop.eup %2092  ;;  %v1185_v16 = vpop.xlane.xlu1 %1184  ;;  %2112 = vrcp.f32 %v1412_v4  ;;  %v1414_v55 = vadd.f32 1.0, %v2091_v54 }
 0x194   :  { %v2095_v24 = vpop.eup %2094  ;;  %2114 = vpow2.f32 %v1972_v6  ;;  %v1432_v56 = vadd.f32 1.0, %v2093_v51  ;;  %v1249_v17 = vadd.f32 %v2741_v43, %v1185_v16  ;;  %v1951_v30 = vmul.f32 -1.442695, %v1223_v60 }
 0x195   :  { %v1409_v11 = vadd.f32 1.0, %v2095_v24  ;;  %v1129_v25 = vpop.xlane.xlu0 %1128  ;;  %v2097_v59 = vpop.eup %2096  ;;  %2116 = vrcp.f32 %v1411_v8 }
 0x196   :  { %v1221_v10 = vadd.f32 %v2741_v43, %v1129_v25  ;;  %v2761_v12 = vpop.eup %2098  ;;  %v1437_v61 = vadd.f32 1.0, %v2097_v59  ;;  %v1977_v36 = vmul.f32 -1.442695, %v1249_v17 }
 0x197   :  { %2118 = vrcp.f32 %v1409_v11  ;;  %v1147_v14 = vpop.xlane.xlu1 %1146  ;;  %v2765_v18 = vpop.eup %2100  ;;  %v1617_v2 = vrot.slane %v2761_v12, %v2774_v35 }
 0x198   :  { %2120 = vrcp.f32 %v1433_v44  ;;  %v1949_v22 = vmul.f32 -1.442695, %v1221_v10  ;;  %v2103_v23 = vpop.eup %2102  ;;  %v1230_v37 = vadd.f32 %v2741_v43, %v1147_v14 }
 0x199   :  { %2122 = vrcp.f32 %v1414_v55  ;;  %v1187_v28 = vpop.xlane.xlu0 %1186  ;;  %v2105_v29 = vpop.eup %2104  ;;  %v1418_v42 = vadd.f32 1.0, %v2103_v23 }
 0x19a   :  { %2124 = vpow2.f32 %v1949_v22  ;;  %v1250_v31 = vadd.f32 %v2741_v43, %v1187_v28  ;;  %v2771_v32 = vpop.eup %2106  ;;  %v1438_v50 = vadd.f32 1.0, %v2105_v29  ;;  %v1958_v49 = vmul.f32 -1.442695, %v1230_v37 }
 0x19b   :  { %2126 = vrcp.f32 %v1432_v56  ;;  %v1143_v39 = vpop.xlane.xlu1 %1142  ;;  %v2109_v33 = vpop.eup %2108  ;;  %v1634_v37 = vadd.s32 4294967256, %v2317_v5 }
 0x19c   :  { %2128 = vpow2.f32 %v1979_v21  ;;  %v2111_v45 = vpop.eup %2110  ;;  %v1978_v58 = vmul.f32 -1.442695, %v1250_v31  ;;  %v1605_v48 = vrot.slane %v2109_v33, %v2779_v40  ;;  %v1228_v24 = vadd.f32 %v2741_v43, %v1143_v39 }
 0x19d   :  { %2130 = vrcp.f32 %v1437_v61  ;;  %v1183_v52 = vpop.xlane.xlu0 %1182  ;;  %v2113_v53 = vpop.eup %2112  ;;  %v1416_v3 = vadd.f32 1.0, %v2111_v45  ;;  %v1641_v45 = vadd.s32 4294967248, %v2317_v5 }
 0x19e   :  { %2132 = vpow2.f32 %v1951_v30  ;;  %v1248_v34 = vadd.f32 %v2741_v43, %v1183_v52  ;;  %v2115_v62 = vpop.eup %2114  ;;  %v1631_v51 = vrot.slane %v2113_v53, %v2782_v41  ;;  %v1956_v22 = vmul.f32 -1.442695, %v1228_v24 }
 0x19f   :  { %2134 = vpow2.f32 %v1977_v36  ;;  %v1197_v38 = vpop.xlane.xlu1 %1196  ;;  %v2117_v9 = vpop.eup %2116  ;;  %v1436_v16 = vadd.f32 1.0, %v2115_v62 }
 0x1a0   :  { %2136 = vrcp.f32 %v1418_v42  ;;  %v1976_v63 = vmul.f32 -1.442695, %v1248_v34  ;;  %v1255_v57 = vadd.f32 %v2741_v43, %v1197_v38  ;;  %v1624_v55 = vrot.slane %v2117_v9, %v2785_v46 }
 0x1a1   :  { %v2119_v1 = vpop.eup %2118  ;;  %2138 = vrcp.f32 %v1438_v50  ;;  %v1141_v4 = vpop.xlane.xlu0 %1140 }
 0x1a2   :  { %v2795_v19 = vpop.eup %2120  ;;  %v1610_v6 = vrot.slane %v2119_v1, %v2788_v47  ;;  %2140 = vpow2.f32 %v1978_v58  ;;  %v1983_v7 = vmul.f32 -1.442695, %v1255_v57  ;;  %v1227_v54 = vadd.f32 %v2741_v43, %v1141_v4 }
 0x1a3   :  { %v2799_v8 = vpop.eup %2122  ;;  %2142 = vpow2.f32 %v1958_v49  ;;  %v1193_v44 = vpop.xlane.xlu1 %1192 }
 0x1a4   :  { %v2125_v0 = vpop.eup %2124  ;;  %v1612_v11 = vsel %vm1611_vm3, %v1610_v6, %v1605_v48  ;;  %2144 = vpow2.f32 %v1976_v63  ;;  %v1955_v25 = vmul.f32 -1.442695, %v1227_v54  ;;  %v1253_v12 = vadd.f32 %v2741_v43, %v1193_v44 }
 0x1a5   :  { %v2805_v59 = vpop.eup %2126  ;;  %v1619_v60 = vsel %vm1618_vm4, %v1617_v2, %v1612_v11  ;;  %v1413_v10 = vadd.f32 1.0, %v2125_v0  ;;  %2146 = vpow2.f32 %v1983_v7  ;;  %v1137_v15 = vpop.xlane.xlu0 %1136  ;;  %v2828_v63 = vsub.s32 %v1634_v37, %v2341_v13 }
 0x1a6   :  { %v2129_v56 = vpop.eup %2128  ;;  %v1626_v17 = vsel %vm1625_vm5, %v1624_v55, %v1619_v60  ;;  %2148 = vpow2.f32 %v1955_v25  ;;  %v1225_v14 = vadd.f32 %v2741_v43, %v1137_v15  ;;  %v1981_v23 = vmul.f32 -1.442695, %v1253_v12 }
 0x1a7   :  { %v2811_v20 = vpop.eup %2130  ;;  %v2814_v21 = vsel %vm1632_vm6, %v1631_v51, %v1626_v17  ;;  %2150 = vrcp.f32 %v1413_v10  ;;  %v1155_v26 = vpop.xlane.xlu1 %1154  ;;  %v1443_v30 = vadd.f32 1.0, %v2129_v56  ;;  %v2832_v48 = vsub.s32 %v1641_v45, %v2341_v13 }
 0x1a8   :  { %v2133_v61 = vpop.eup %2132  ;;  %2152 = vrcp.f32 %v1416_v3  ;;  %v1953_v27 = vmul.f32 -1.442695, %v1225_v14  ;;  %v1234_v28 = vadd.f32 %v2741_v43, %v1155_v26  ;;  %v1648_v37 = vadd.s32 4294967240, %v2317_v5 }
 0x1a9   :  { %v2135_v29 = vpop.eup %2134  ;;  %2154 = vrcp.f32 %v1436_v16  ;;  %v1195_v31 = vpop.xlane.xlu0 %1194  ;;  %v1415_v50 = vadd.f32 1.0, %v2133_v61  ;;  %v1645_v60 = vrot.slane %v2799_v8, %v2832_v48 }
 0x1aa   :  { %v2817_v36 = vpop.eup %2136  ;;  %2156 = vpow2.f32 %v1981_v23  ;;  %v1962_v39 = vmul.f32 -1.442695, %v1234_v28  ;;  %v1254_v33 = vadd.f32 %v2741_v43, %v1195_v31  ;;  %v1441_v49 = vadd.f32 1.0, %v2135_v29 }
 0x1ab   :  { %v2821_v42 = vpop.eup %2138  ;;  %2158 = vpow2.f32 %v1956_v22  ;;  %v1151_v52 = vpop.xlane.xlu1 %1150 }
 0x1ac   :  { %v2141_v53 = vpop.eup %2140  ;;  %2160 = vpow2.f32 %v1953_v27  ;;  %v1982_v58 = vmul.f32 -1.442695, %v1254_v33  ;;  %v1232_v34 = vadd.f32 %v2741_v43, %v1151_v52 }
 0x1ad   :  { %v2825_v62 = vpop.eup %2142  ;;  %2162 = vrcp.f32 %v1443_v30  ;;  %v1191_v38 = vpop.xlane.xlu0 %1190  ;;  %v1442_v3 = vadd.f32 1.0, %v2141_v53 }
 0x1ae   :  { %v2145_v9 = vpop.eup %2144  ;;  %2164 = vpow2.f32 %v1962_v39  ;;  %v1960_v57 = vmul.f32 -1.442695, %v1232_v34  ;;  %v1252_v1 = vadd.f32 %v2741_v43, %v1191_v38  ;;  %v1662_v34 = vadd.s32 4294967224, %v2317_v5 }
 0x1af   :  { %v2147_v2 = vpop.eup %2146  ;;  %2166 = vrcp.f32 %v1415_v50  ;;  %v1157_v4 = vpop.xlane.xlu1 %1156  ;;  %v1440_v16 = vadd.f32 1.0, %v2145_v9  ;;  %v1669_v50 = vadd.s32 4294967216, %v2317_v5 }
 0x1b0   :  { %v2149_v6 = vpop.eup %2148  ;;  %2168 = vpow2.f32 %v1982_v58  ;;  %v1980_v7 = vmul.f32 -1.442695, %v1252_v1  ;;  %v1235_v54 = vadd.f32 %v2741_v43, %v1157_v4  ;;  %v1447_v10 = vadd.f32 1.0, %v2147_v2 }
 0x1b1   :  { %v2151_v51 = vpop.eup %2150  ;;  %2170 = vrcp.f32 %v1441_v49  ;;  %v1145_v24 = vpop.xlane.xlu0 %1144  ;;  %v1419_v17 = vadd.f32 1.0, %v2149_v6  ;;  %v2863_v4 = vsub.s32 %v1648_v37, %v2341_v13 }
 0x1b2   :  { %v2835_v44 = vpop.eup %2152  ;;  %v1638_v0 = vrot.slane %v2151_v51, %v2828_v63  ;;  %2172 = vpow2.f32 %v1960_v57  ;;  %v1963_v55 = vmul.f32 -1.442695, %v1235_v54  ;;  %v1229_v11 = vadd.f32 %v2741_v43, %v1145_v24 }
 0x1b3   :  { %v2839_v25 = vpop.eup %2154  ;;  %2174 = vrcp.f32 %v1442_v3  ;;  %v1205_v12 = vpop.xlane.xlu1 %1204  ;;  %v1655_v57 = vadd.s32 4294967232, %v2317_v5  ;;  %v2868_v54 = vsub.s32 %v1669_v50, %v2341_v13 }
 0x1b4   :  { %v2157_v15 = vpop.eup %2156  ;;  %v1640_v56 = vsel %vm1639_vm7, %v1638_v0, %v2814_v21  ;;  %2176 = vpow2.f32 %v1980_v7  ;;  %v1259_v23 = vadd.f32 %v2741_v43, %v1205_v12  ;;  %v1957_v8 = vmul.f32 -1.442695, %v1229_v11 }
 0x1b5   :  { %v2845_v14 = vpop.eup %2158  ;;  %v2848_v22 = vsel %vm1646_vm8, %v1645_v60, %v1640_v56  ;;  %2178 = vrcp.f32 %v1440_v16  ;;  %v1203_v26 = vpop.xlane.xlu0 %1202  ;;  %v1445_v21 = vadd.f32 1.0, %v2157_v15  ;;  %v2878_v12 = vsub.s32 %v1655_v57, %v2341_v13 }
 0x1b6   :  { %v2161_v61 = vpop.eup %2160  ;;  %2180 = vpow2.f32 %v1963_v55  ;;  %v1258_v27 = vadd.f32 %v2741_v43, %v1203_v26  ;;  %v1987_v52 = vmul.f32 -1.442695, %v1259_v23  ;;  %v2872_v55 = vsub.s32 %v1662_v34, %v2341_v13 }
 0x1b7   :  { %v2852_v28 = vpop.eup %2162  ;;  %2182 = vrcp.f32 %v1447_v10  ;;  %v1417_v29 = vadd.f32 1.0, %v2161_v61  ;;  %v1153_v30 = vpop.xlane.xlu1 %1152 }
 0x1b8   :  { %v2165_v31 = vpop.eup %2164  ;;  %2184 = vrcp.f32 %v1419_v17  ;;  %v1986_v39 = vmul.f32 -1.442695, %v1258_v27  ;;  %v1233_v33 = vadd.f32 %v2741_v43, %v1153_v30 }
 0x1b9   :  { %v2167_v45 = vpop.eup %2166  ;;  %2186 = vrcp.f32 %v1417_v29  ;;  %v1199_v53 = vpop.xlane.xlu0 %1198  ;;  %v1426_v1 = vadd.f32 1.0, %v2165_v31 }
 0x1ba   :  { %v2169_v58 = vpop.eup %2168  ;;  %2188 = vpow2.f32 %v1957_v8  ;;  %v1961_v49 = vmul.f32 -1.442695, %v1233_v33  ;;  %v1256_v38 = vadd.f32 %v2741_v43, %v1199_v53  ;;  %v1652_v23 = vrot.slane %v2167_v45, %v2863_v4 }
 0x1bb   :  { %v2859_v9 = vpop.eup %2170  ;;  %2190 = vrcp.f32 %v1445_v21  ;;  %v1201_v2 = vpop.xlane.xlu1 %1200  ;;  %v1446_v51 = vadd.f32 1.0, %v2169_v58  ;;  %v1659_v33 = vrot.slane %v2835_v44, %v2878_v12 }
 0x1bc   :  { %v2173_v3 = vpop.eup %2172  ;;  %2192 = vpow2.f32 %v1986_v39  ;;  %v1984_v6 = vmul.f32 -1.442695, %v1256_v38  ;;  %v1257_v16 = vadd.f32 %v2741_v43, %v1201_v2  ;;  %v1654_v30 = vsel %vm1653_vm9, %v1652_v23, %v2848_v22 }
 0x1bd   :  { %v2865_v7 = vpop.eup %2174  ;;  %2194 = vpow2.f32 %v1987_v52  ;;  %v1163_v24 = vpop.xlane.xlu0 %1162  ;;  %v1424_v11 = vadd.f32 1.0, %v2173_v3  ;;  %v1661_v38 = vsel %vm1660_vm10, %v1659_v33, %v1654_v30 }
 0x1be   :  { %v2177_v0 = vpop.eup %2176  ;;  %2196 = vpow2.f32 %v1961_v49  ;;  %v1238_v60 = vadd.f32 %v2741_v43, %v1163_v24  ;;  %v1985_v26 = vmul.f32 -1.442695, %v1257_v16  ;;  %v1673_v49 = vrot.slane %v2817_v36, %v2868_v54 }
 0x1bf   :  { %v2875_v10 = vpop.eup %2178  ;;  %2198 = vrcp.f32 %v1426_v1  ;;  %v1444_v15 = vadd.f32 1.0, %v2177_v0  ;;  %v1165_v56 = vpop.xlane.xlu1 %1164 }
 0x1c0   :  { %v2181_v17 = vpop.eup %2180  ;;  %2200 = vpow2.f32 %v1984_v6  ;;  %v1239_v61 = vadd.f32 %v2741_v43, %v1165_v56  ;;  %v1966_v27 = vmul.f32 -1.442695, %v1238_v60  ;;  %v1793_v60 = vrot.slane %v2875_v10, %v2779_v40 }
 0x1c1   :  { %v2882_v8 = vpop.eup %2182  ;;  %2202 = vrcp.f32 %v1446_v51  ;;  %v1159_v21 = vpop.xlane.xlu0 %1158  ;;  %v1427_v45 = vadd.f32 1.0, %v2181_v17 }
 0x1c2   :  { %v2884_v29 = vpop.eup %2184  ;;  %2204 = vrcp.f32 %v1424_v11  ;;  %v1967_v31 = vmul.f32 -1.442695, %v1239_v61  ;;  %v1236_v37 = vadd.f32 %v2741_v43, %v1159_v21  ;;  %v1797_v21 = vrot.slane %v2859_v9, %v2788_v47 }
 0x1c3   :  { %v2187_v39 = vpop.eup %2186  ;;  %2206 = vrcp.f32 %v1444_v15  ;;  %v1161_v50 = vpop.xlane.xlu1 %1160 }
 0x1c4   :  { %v2891_v52 = vpop.eup %2188  ;;  %v1666_v53 = vrot.slane %v2187_v39, %v2872_v55  ;;  %2208 = vpow2.f32 %v1985_v26  ;;  %v1964_v58 = vmul.f32 -1.442695, %v1236_v37  ;;  %v1237_v22 = vadd.f32 %v2741_v43, %v1161_v50 }
 0x1c5   :  { %v2895_v34 = vpop.eup %2190  ;;  %2210 = vpow2.f32 %v1966_v27  ;;  %v1149_v44 = vpop.xlane.xlu0 %1148 }
 0x1c6   :  { %v2193_v57 = vpop.eup %2192  ;;  %v1668_v1 = vsel %vm1667_vm11, %v1666_v53, %v1661_v38  ;;  %2212 = vpow2.f32 %v1967_v31  ;;  %v1965_v2 = vmul.f32 -1.442695, %v1237_v22  ;;  %v1231_v16 = vadd.f32 %v2741_v43, %v1149_v44 }
 0x1c7   :  { %v2901_v3 = vpop.eup %2194  ;;  %v2904_v6 = vsel %vm1674_vm12, %v1673_v49, %v1668_v1  ;;  %2214 = vrcp.f32 %v1427_v45  ;;  %v1450_v51 = vadd.f32 1.0, %v2193_v57  ;;  %v1181_v24 = vpop.xlane.xlu1 %1180  ;;  %v1798_v45 = vsel %vm1611_vm3, %v1797_v21, %v1793_v60 }
 0x1c8   :  { %v2197_v36 = vpop.eup %2196  ;;  %2216 = vpow2.f32 %v1964_v58  ;;  %v1247_v0 = vadd.f32 %v2741_v43, %v1181_v24  ;;  %v1959_v56 = vmul.f32 -1.442695, %v1231_v16  ;;  %v1802_v58 = vrot.slane %v2865_v7, %v2774_v35 }
 0x1c9   :  { %v2908_v11 = vpop.eup %2198  ;;  %2218 = vrcp.f32 %v1450_v51  ;;  %v1425_v15 = vadd.f32 1.0, %v2197_v36  ;;  %v1207_v17 = vpop.xlane.xlu0 %1206  ;;  %v1807_v7 = vrot.slane %v2852_v28, %v2785_v46  ;;  %v1421_v28 = vadd.f32 1.0, %v2891_v52 }
 0x1ca   :  { %v2201_v23 = vpop.eup %2200  ;;  %2220 = vpow2.f32 %v1965_v2  ;;  %v1975_v26 = vmul.f32 -1.442695, %v1247_v0  ;;  %v1260_v61 = vadd.f32 %v2741_v43, %v1207_v17  ;;  %v1803_v1 = vsel %vm1618_vm4, %v1802_v58, %v1798_v45 }
 0x1cb   :  { %v2913_v27 = vpop.eup %2202  ;;  %2222 = vrcp.f32 %v1425_v15  ;;  %v1448_v30 = vadd.f32 1.0, %v2201_v23  ;;  %v1209_v31 = vpop.xlane.xlu1 %1208  ;;  %v1808_v17 = vsel %vm1625_vm5, %v1807_v7, %v1803_v1  ;;  %v1683_v7 = vadd.s32 4294967200, %v2317_v5 }
 0x1cc   :  { %v2917_v37 = vpop.eup %2204  ;;  %2224 = vpow2.f32 %v1959_v56  ;;  %v1988_v10 = vmul.f32 -1.442695, %v1260_v61  ;;  %v1261_v39 = vadd.f32 %v2741_v43, %v1209_v31  ;;  %v1676_v56 = vadd.s32 4294967208, %v2317_v5 }
 0x1cd   :  { %v2207_v33 = vpop.eup %2206  ;;  %2226 = vrcp.f32 %v1448_v30  ;;  %v1211_v50 = vpop.xlane.xlu0 %1210  ;;  %v1817_v31 = vrot.slane %v2895_v34, %v2828_v63  ;;  %v1822_v34 = vrot.slane %v2913_v27, %v2832_v48 }
 0x1ce   :  { %v2209_v53 = vpop.eup %2208  ;;  %2228 = vpow2.f32 %v1975_v26  ;;  %v1989_v9 = vmul.f32 -1.442695, %v1261_v39  ;;  %v1262_v38 = vadd.f32 %v2741_v43, %v1211_v50  ;;  %v1812_v2 = vrot.slane %v2207_v33, %v2782_v41 }
 0x1cf   :  { %v2211_v22 = vpop.eup %2210  ;;  %v1449_v49 = vadd.f32 1.0, %v2209_v53  ;;  %2230 = vpow2.f32 %v1988_v10  ;;  %v1213_v44 = vpop.xlane.xlu1 %1212  ;;  %v1420_v33 = vadd.f32 1.0, %v2845_v14 }
 0x1d0   :  { %v2213_v57 = vpop.eup %2212  ;;  %v1430_v51 = vadd.f32 1.0, %v2211_v22  ;;  %2232 = vpow2.f32 %v1989_v9  ;;  %v1990_v0 = vmul.f32 -1.442695, %v1262_v38  ;;  %v1263_v60 = vadd.f32 %v2741_v43, %v1213_v44 }
 0x1d1   :  { %v2926_v16 = vpop.eup %2214  ;;  %2234 = vrcp.f32 %v1449_v49  ;;  %v1431_v24 = vadd.f32 1.0, %v2213_v57  ;;  %v1813_v61 = vsel %vm1632_vm6, %v1812_v2, %v1808_v17  ;;  %v1451_v43 = vadd.f32 1.0, %v2901_v3 }
 0x1d2   :  { %v2217_v36 = vpop.eup %2216  ;;  %2236 = vrcp.f32 %v1430_v51  ;;  %v1991_v21 = vmul.f32 -1.442695, %v1263_v60  ;;  %v1818_v53 = vsel %vm1639_vm7, %v1817_v31, %v1813_v61  ;;  %v2944_v9 = vsub.s32 %v1676_v56, %v2341_v13 }
 0x1d3   :  { %v2931_v15 = vpop.eup %2218  ;;  %2238 = vrcp.f32 %v1431_v24  ;;  %v1428_v23 = vadd.f32 1.0, %v2217_v36  ;;  %v1714_v3 = vrot.slane %v2917_v37, %v2779_v40  ;;  %v1697_v22 = vadd.s32 4294967184, %v2317_v5 }
 0x1d4   :  { %v2221_v26 = vpop.eup %2220  ;;  %2240 = vpow2.f32 %v1990_v0  ;;  %v1422_v49 = vadd.f32 1.0, %v2825_v62  ;;  %v1823_v57 = vsel %vm1646_vm8, %v1822_v34, %v1818_v53  ;;  %v1827_v62 = vrot.slane %v2882_v8, %v2863_v4 }
 0x1d5   :  { %v2223_v30 = vpop.eup %2222  ;;  %2242 = vrcp.f32 %v1428_v23  ;;  %v1429_v10 = vadd.f32 1.0, %v2221_v26  ;;  %v1723_v24 = vrot.slane %v2908_v11, %v2774_v35  ;;  %v2965_v60 = vsub.s32 %v1697_v22, %v2341_v13 }
 0x1d6   :  { %v2225_v39 = vpop.eup %2224  ;;  %v1718_v45 = vrot.slane %v2223_v30, %v2788_v47  ;;  %2244 = vpow2.f32 %v1991_v21  ;;  %v1690_v47 = vadd.s32 4294967192, %v2317_v5  ;;  %v1704_v56 = vadd.s32 4294967176, %v2317_v5 }
 0x1d7   :  { %v2227_v50 = vpop.eup %2226  ;;  %2246 = vrcp.f32 %v1429_v10  ;;  %v1423_v52 = vadd.f32 1.0, %v2225_v39  ;;  %v1828_v8 = vsel %vm1653_vm9, %v1827_v62, %v1823_v57  ;;  %v1728_v11 = vrot.slane %v2926_v16, %v2785_v46 }
 0x1d8   :  { %v2229_v58 = vpop.eup %2228  ;;  %2248 = vrcp.f32 %v1421_v28  ;;  %v1719_v44 = vsel %vm1611_vm3, %v1718_v45, %v1714_v3  ;;  %v1832_v2 = vrot.slane %v2227_v50, %v2878_v12  ;;  %v2962_v0 = vsub.s32 %v1690_v47, %v2341_v13 }
 0x1d9   :  { %v2231_v14 = vpop.eup %2230  ;;  %2250 = vrcp.f32 %v1451_v43  ;;  %v1439_v40 = vadd.f32 1.0, %v2229_v58  ;;  %v1724_v23 = vsel %vm1618_vm4, %v1723_v24, %v1719_v44  ;;  %v1686_v5 = vsub.s32 %v1683_v7, %v2341_v13 }
 0x1da   :  { %v2233_v38 = vpop.eup %2232  ;;  %2252 = vrcp.f32 %v1420_v33  ;;  %v1452_v1 = vadd.f32 1.0, %v2231_v14  ;;  %v1833_v61 = vsel %vm1660_vm10, %v1832_v2, %v1828_v8  ;;  %v1729_v43 = vsel %vm1625_vm5, %v1728_v11, %v1724_v23 }
 0x1db   :  { %v2235_v27 = vpop.eup %2234  ;;  %2254 = vrcp.f32 %v1423_v52  ;;  %v1453_v37 = vadd.f32 1.0, %v2233_v38  ;;  %v1842_v50 = vrot.slane %v2931_v15, %v2868_v54  ;;  %v1707_v53 = vsub.s32 %v1704_v56, %v2341_v13 }
 0x1dc   :  { %v2237_v51 = vpop.eup %2236  ;;  %2256 = vrcp.f32 %v1452_v1  ;;  %v1837_v26 = vrot.slane %v2235_v27, %v2872_v55  ;;  %v1680_v58 = vrot.slane %v2884_v29, %v2944_v9  ;;  %v1758_v14 = vrot.slane %v2795_v19, %v2872_v55 }
 0x1dd   :  { %v2239_v36 = vpop.eup %2238  ;;  %2258 = vrcp.f32 %v1453_v37  ;;  %v1753_v15 = vrot.slane %v2805_v59, %v2878_v12  ;;  %v1763_v19 = vrot.slane %v2771_v32, %v2868_v54  ;;  %v1768_v57 = vrot.slane %v2765_v18, %v2944_v9 }
 0x1de   :  { %v2241_v17 = vpop.eup %2240  ;;  %2260 = vrcp.f32 %v1422_v49  ;;  %v1838_v46 = vsel %vm1667_vm11, %v1837_v26, %v1833_v61  ;;  %v1748_v34 = vrot.slane %v2239_v36, %v2863_v4  ;;  %v1682_v29 = vsel %vm1681_vm13, %v1680_v58, %v2904_v6 }
 0x1df   :  { %v2243_v35 = vpop.eup %2242  ;;  %2262 = vrcp.f32 %v1439_v40  ;;  %v1454_v28 = vadd.f32 1.0, %v2241_v17  ;;  %v1773_v40 = vrot.slane %v2839_v25, %v1686_v5  ;;  %v1783_v24 = vrot.slane %v2821_v42, %v2965_v60 }
 0x1e0   :  { %v2245_v21 = vpop.eup %2244  ;;  %v1733_v30 = vrot.slane %v2243_v35, %v2782_v41  ;;  %v1743_v41 = vrot.slane %v2237_v51, %v2832_v48  ;;  %v1843_v48 = vsel %vm1674_vm12, %v1842_v50, %v1838_v46  ;;  %v1778_v51 = vrot.slane %v2811_v20, %v2962_v0 }
 0x1e1   :  { %v2247_v31 = vpop.eup %2246  ;;  %2264 = vrcp.f32 %v1454_v28  ;;  %v1455_v10 = vadd.f32 1.0, %v2245_v21  ;;  %vm1871_vm3 = vcmask 1042434  }
 0x1e2   :  { %v2249_v39 = vpop.eup %2248  ;;  %v1734_v16 = vsel %vm1632_vm6, %v1733_v30, %v1729_v43  ;;  %v1738_v33 = vrot.slane %v2247_v31, %v2828_v63 }
 0x1e3   :  { %v2251_v45 = vpop.eup %2250  ;;  %2266 = vrcp.f32 %v1455_v10  ;;  %v1694_v4 = vrot.slane %v2249_v39, %v2962_v0 }
 0x1e4   :  { %v2253_v52 = vpop.eup %2252  ;;  %v1739_v3 = vsel %vm1639_vm7, %v1738_v33, %v1734_v16  ;;  %v1847_v22 = vrot.slane %v2251_v45, %v2944_v9 }
 0x1e5   :  { %v2255_v63 = vpop.eup %2254  ;;  %v1744_v13 = vsel %vm1646_vm8, %v1743_v41, %v1739_v3  ;;  %v1687_v55 = vrot.slane %v2253_v52, %v1686_v5 }
 0x1e6   :  { %v2257_v47 = vpop.eup %2256  ;;  %v1749_v49 = vsel %vm1653_vm9, %v1748_v34, %v1744_v13  ;;  %v1848_v1 = vsel %vm1681_vm13, %v1847_v22, %v1843_v48  ;;  %v1708_v9 = vrot.slane %v2255_v63, %v1707_v53 }
 0x1e7   :  { %v2259_v38 = vpop.eup %2258  ;;  %v1754_v59 = vsel %vm1660_vm10, %v1753_v15, %v1749_v49  ;;  %v1852_v12 = vrot.slane %v2257_v47, %v1686_v5  ;;  %v1689_v37 = vsel %vm1688_vm14, %v1687_v55, %v1682_v29 }
 0x1e8   :  { %v2261_v44 = vpop.eup %2260  ;;  %v1759_v6 = vsel %vm1667_vm11, %v1758_v14, %v1754_v59  ;;  %v1857_v27 = vrot.slane %v2259_v38, %v2962_v0  ;;  %v1696_v18 = vsel %vm1695_vm15, %v1694_v4, %v1689_v37 }
 0x1e9   :  { %v2263_v2 = vpop.eup %2262  ;;  %v1764_v32 = vsel %vm1674_vm12, %v1763_v19, %v1759_v6  ;;  %v1853_v54 = vsel %vm1688_vm14, %v1852_v12, %v1848_v1  ;;  %v1701_v25 = vrot.slane %v2261_v44, %v2965_v60 }
 0x1ea   :  { %v1769_v7 = vsel %vm1681_vm13, %v1768_v57, %v1764_v32  ;;  %v1858_v56 = vsel %vm1695_vm15, %v1857_v27, %v1853_v54  ;;  %v1788_v23 = vrot.slane %v2263_v2, %v1707_v53 }
 0x1eb   :  { %v2265_v62 = vpop.eup %2264  ;;  %v1774_v36 = vsel %vm1688_vm14, %v1773_v40, %v1769_v7  ;;  %v1703_v8 = vsel %vm1702_vm0, %v1701_v25, %v1696_v18 }
 0x1ec   :  { %v1779_v17 = vsel %vm1695_vm15, %v1778_v51, %v1774_v36  ;;  %v1862_v20 = vrot.slane %v2265_v62, %v2965_v60  ;;  %v1710_v42 = vsel %vm1709_vm1, %v1708_v9, %v1703_v8 }
 0x1ed   :  { %v2267_v0 = vpop.eup %2266  ;;  %v1784_v26 = vsel %vm1702_vm0, %v1783_v24, %v1779_v17 }
 0x1ee   :  { %v1789_v35 = vsel %vm1709_vm1, %v1788_v23, %v1784_v26  ;;  %v1863_v11 = vsel %vm1702_vm0, %v1862_v20, %v1858_v56  ;;  %v1867_v61 = vrot.slane %v2267_v0, %v1707_v53 }
 0x1ef   :  { %v1870_v28 = vsel %vm1869_vm2, %v1789_v35, %v1710_v42 }
 0x1f0   :  { %v1868_v21 = vsel %vm1709_vm1, %v1867_v61, %v1863_v11 }
 0x1f1   :  { %v1872_v5 = vsel %vm1871_vm3, %v1868_v21, %v1870_v28 }
 0x1f2   :  { %1874 = vst [vmem:[%s3037_s6] sm:$0x7] %v1872_v5 }

</bundles_post_ra>
